<compile_context>
chip_gen: v7x
topology: tpu7x:2x2x1
jax: 0.10.0
libtpu: 0.0.40
codegen_flags: <defaults>
</compile_context>

<pallas_src>
import numpy as np
import jax
import jax.numpy as jnp
from jax.experimental import pallas as pl
from jax.experimental.pallas import tpu as pltpu


def _make_concat_dma_kernel(flat_sizes):
    """Kernel concatenating len(flat_sizes) (N, Ci*H*W) inputs along dim 1 via
    direct HBM->HBM async copies (no VMEM staging)."""
    offsets = np.cumsum([0] + list(flat_sizes)).tolist()
    n_in = len(flat_sizes)

    def kernel(*refs):
        in_refs = refs[:n_in]
        out_ref = refs[n_in]
        sem = refs[n_in + 1]

        copies = []
        for k, (r, off, sz) in enumerate(zip(in_refs, offsets[:-1], flat_sizes)):
            # Static slice of the HBM output ref; per batch row the destination
            # is one contiguous chunk of Ci*H*W elements (row stride =
            # C_total*H*W), so the DMA engine does a simple strided bulk copy
            # with no vld/vst slot work.
            cp = pltpu.make_async_copy(r, out_ref.at[:, off:off + sz], sem.at[k])
            cp.start()
            copies.append(cp)

        # Disjoint channel ranges -> no ordering constraints between copies.
        for cp in copies:
            cp.wait()

    return kernel


def tt_concat(xs, dimension=1):
    """Pallas TPU implementation of ttnn.concat(xs, dim=1) for NCHW tensors."""
    assert dimension == 1, "TtConcat kernel implemented for channel dim (1)"
    assert len(xs) >= 1
    N, _, H, W = xs[0].shape
    dtype = xs[0].dtype
    for x in xs:
        assert x.shape[0] == N and x.shape[2] == H and x.shape[3] == W
        assert x.dtype == dtype

    channels = [int(x.shape[1]) for x in xs]
    c_total = sum(channels)
    hw = H * W
    flat_sizes = [c * hw for c in channels]

    # Free (bitcast) reshapes: NCHW is row-major contiguous, so (N, C, H, W)
    # <-> (N, C*H*W) involves no data movement.
    xs_flat = [x.reshape(N, c * hw) for x, c in zip(xs, channels)]

    kernel = _make_concat_dma_kernel(flat_sizes)

    out_flat = pl.pallas_call(
        kernel,
        out_shape=jax.ShapeDtypeStruct((N, c_total * hw), dtype),
        # Raw HBM refs: no auto-DMA, no VMEM blocks, no grid — one kernel
        # invocation that only launches DMAs and waits on them.
        in_specs=[pl.BlockSpec(memory_space=pl.ANY) for _ in xs],
        out_specs=pl.BlockSpec(memory_space=pl.ANY),
        scratch_shapes=[pltpu.SemaphoreType.DMA((len(xs),))],
    )(*xs_flat)

    return out_flat.reshape(N, c_total, H, W)


if __name__ == "__main__":
    key = jax.random.PRNGKey(0)
    k1, k2, k3, k4, k5 = jax.random.split(key, 5)

    # Case 1: yolov3-style concat of two NCHW feature maps along channels.
    x1 = jax.random.normal(k1, (2, 4, 16, 16), dtype=jnp.float32)
    x2 = jax.random.normal(k2, (2, 4, 16, 16), dtype=jnp.float32)

    out = jax.block_until_ready(tt_concat([x1, x2], dimension=1))
    ref = jnp.concatenate([x1, x2], axis=1)
    assert out.shape == ref.shape, (out.shape, ref.shape)
    np.testing.assert_allclose(np.asarray(out), np.asarray(ref), rtol=0, atol=0)

    # Case 2: three inputs with mixed (unaligned) channel counts — the DMA path
    # has no sublane/lane alignment requirement, so this stays exact and fast.
    y1 = jax.random.normal(k3, (2, 4, 16, 16), dtype=jnp.float32)
    y2 = jax.random.normal(k4, (2, 6, 16, 16), dtype=jnp.float32)
    y3 = jax.random.normal(k5, (2, 2, 16, 16), dtype=jnp.float32)

    out2 = jax.block_until_ready(tt_concat([y1, y2, y3], dimension=1))
    ref2 = jnp.concatenate([y1, y2, y3], axis=1)
    assert out2.shape == ref2.shape, (out2.shape, ref2.shape)
    np.testing.assert_allclose(np.asarray(out2), np.asarray(ref2), rtol=0, atol=0)

    print("KERNEL_OK")
</pallas_src>

<mosaic_0001>
module attributes {stable_mosaic.version = 11 : i64} {
  func.func @kernel(%arg0: memref<2x1024xf32, #tpu.memory_space<any>>, %arg1: memref<2x1024xf32, #tpu.memory_space<any>>, %arg2: memref<2x2048xf32, #tpu.memory_space<any>>, %arg3: memref<2x!tpu.dma_semaphore, #tpu.memory_space<semaphore_mem>>) attributes {dimension_semantics = [], scalar_prefetch = 0 : i64, scratch_operands = 1 : i64, tpu.core_type = #tpu.core_type<tc>} {
    %c0_i32 = arith.constant 0 : i32
    %c0_i32_0 = arith.constant 0 : i32
    %c0_i32_1 = arith.constant 0 : i32
    %0 = tpu.memref_slice %arg2[%c0_i32_0, %c0_i32_1] : memref<2x2048xf32, #tpu.memory_space<any>> -> memref<2x1024xf32, #tpu.memory_space<any>>
    %1 = tpu.memref_slice %arg3[%c0_i32] : memref<2x!tpu.dma_semaphore, #tpu.memory_space<semaphore_mem>> -> memref<1x!tpu.dma_semaphore, #tpu.memory_space<semaphore_mem>>
    %2 = tpu.memref_squeeze %1 : memref<1x!tpu.dma_semaphore, #tpu.memory_space<semaphore_mem>> -> memref<!tpu.dma_semaphore, #tpu.memory_space<semaphore_mem>>
    tpu.enqueue_dma source(%arg0 : memref<2x1024xf32, #tpu.memory_space<any>>) target(%0 : memref<2x1024xf32, #tpu.memory_space<any>>) target_semaphore(%2 : memref<!tpu.dma_semaphore, #tpu.memory_space<semaphore_mem>>)
    %c1_i32 = arith.constant 1 : i32
    %c0_i32_2 = arith.constant 0 : i32
    %c1024_i32 = arith.constant 1024 : i32
    %3 = tpu.memref_slice %arg2[%c0_i32_2, %c1024_i32] : memref<2x2048xf32, #tpu.memory_space<any>> -> memref<2x1024xf32, #tpu.memory_space<any>>
    %4 = tpu.memref_slice %arg3[%c1_i32] : memref<2x!tpu.dma_semaphore, #tpu.memory_space<semaphore_mem>> -> memref<1x!tpu.dma_semaphore, #tpu.memory_space<semaphore_mem>>
    %5 = tpu.memref_squeeze %4 : memref<1x!tpu.dma_semaphore, #tpu.memory_space<semaphore_mem>> -> memref<!tpu.dma_semaphore, #tpu.memory_space<semaphore_mem>>
    tpu.enqueue_dma source(%arg1 : memref<2x1024xf32, #tpu.memory_space<any>>) target(%3 : memref<2x1024xf32, #tpu.memory_space<any>>) target_semaphore(%5 : memref<!tpu.dma_semaphore, #tpu.memory_space<semaphore_mem>>)
    %c0_i32_3 = arith.constant 0 : i32
    %c0_i32_4 = arith.constant 0 : i32
    %c0_i32_5 = arith.constant 0 : i32
    %6 = tpu.memref_slice %arg2[%c0_i32_4, %c0_i32_5] : memref<2x2048xf32, #tpu.memory_space<any>> -> memref<2x1024xf32, #tpu.memory_space<any>>
    %7 = tpu.memref_slice %arg3[%c0_i32_3] : memref<2x!tpu.dma_semaphore, #tpu.memory_space<semaphore_mem>> -> memref<1x!tpu.dma_semaphore, #tpu.memory_space<semaphore_mem>>
    %8 = tpu.memref_squeeze %7 : memref<1x!tpu.dma_semaphore, #tpu.memory_space<semaphore_mem>> -> memref<!tpu.dma_semaphore, #tpu.memory_space<semaphore_mem>>
    tpu.wait_dma2 semaphore(%8 : memref<!tpu.dma_semaphore, #tpu.memory_space<semaphore_mem>>) src(%arg0 : memref<2x1024xf32, #tpu.memory_space<any>>) dst(%6 : memref<2x1024xf32, #tpu.memory_space<any>>)
    %c1_i32_6 = arith.constant 1 : i32
    %c0_i32_7 = arith.constant 0 : i32
    %c1024_i32_8 = arith.constant 1024 : i32
    %9 = tpu.memref_slice %arg2[%c0_i32_7, %c1024_i32_8] : memref<2x2048xf32, #tpu.memory_space<any>> -> memref<2x1024xf32, #tpu.memory_space<any>>
    %10 = tpu.memref_slice %arg3[%c1_i32_6] : memref<2x!tpu.dma_semaphore, #tpu.memory_space<semaphore_mem>> -> memref<1x!tpu.dma_semaphore, #tpu.memory_space<semaphore_mem>>
    %11 = tpu.memref_squeeze %10 : memref<1x!tpu.dma_semaphore, #tpu.memory_space<semaphore_mem>> -> memref<!tpu.dma_semaphore, #tpu.memory_space<semaphore_mem>>
    tpu.wait_dma2 semaphore(%11 : memref<!tpu.dma_semaphore, #tpu.memory_space<semaphore_mem>>) src(%arg1 : memref<2x1024xf32, #tpu.memory_space<any>>) dst(%9 : memref<2x1024xf32, #tpu.memory_space<any>>)
    return
  }
}

</mosaic_0001>

<bundles_post_ra>
// kernel: tpu_custom_call.1
= control target key start
LH: loop header
LB: loop body
LE: loop exit
PB: predicated region body
PF: predicated region fallthrough
CT: control target
= control target key end

     0   :  { %s65_s12 = smov [#allocation2]   ;;  %s66_s13 = smov [#allocation3]   ;;  %s97_s0 = inlined_call_operand.hbm [shape: f32[2,1024], index: 0, kind: input, shape index: {}]   ;;  %s98_s2 = inlined_call_operand.hbm [shape: f32[2,2048], index: 2, kind: output, shape index: {}]   ;;  %s99_s1 = inlined_call_operand.hbm [shape: f32[2,1024], index: 1, kind: input, shape index: {}]  }
   0x1   :  { %s20_s11 = scalar_lea.hbm %s98_s2, 256  ;;  %s67_s14 = smov 0  }
   0x2   :  { %19 = dma.general %s97_s0, 256, %s98_s2, %s65_s12, %s66_s13, [#allocation4], %s67_s14, 0  }
   0x3   :  { %s68_s19 = smov [#allocation2 + $0x1]   ;;  %s69_s20 = smov [#allocation5]  }
   0x4   :  { %34 = dma.general %s99_s1, 256, %s20_s11, %s68_s19, %s69_s20, [#allocation6], %s67_s14, 0  }
   0x5   :  { %61 = dma.done.wait [#allocation2], 256 }
   0x6   :  { %62 = vsyncadd [#allocation2], 4294967040 }
   0x7   :  { %63 = dma.done.wait [#allocation2 + $0x1], 256 }
   0x8   :  { %64 = vsyncadd [#allocation2 + $0x1], 4294967040 }
   0x9   :  { %41 = vsyncmov [#allocation2] }
   0xc   :  { %s42_s23 = vpop.sfrf %41 }
   0xd   :  { %p54_p0 = scmp.ne.s32.totalorder %s42_s23, 0 }
   0xf   :  { %46 = shalt.err (%p54_p0)  }
  0x10   :  { %48 = vsyncmov [#allocation2 + $0x1] }
  0x13   :  { %s49_s24 = vpop.sfrf %48 }
  0x14   :  { %p55_p1 = scmp.ne.s32.totalorder %s49_s24, 0 }
  0x16   :  { %53 = shalt.err (%p55_p1)  }

</bundles_post_ra>
